<compile_context>
chip_gen: v6e
topology: v6e:2x2x1
jax: 0.10.0
libtpu: 0.0.40
codegen_flags: <defaults>
</compile_context>

<pallas_src>
import jax
import jax.numpy as jnp
from jax.experimental import pallas as pl
from jax.experimental.pallas import tpu as pltpu

_NC_PAD = 128  # lane-padded output width (unmasked 128-lane store)


def _slowfast_kernel(x_ref, w1_ref, b1_ref, w2_ref, b2_ref, o_ref):
    """Fused dual-pathway stem for one batch element.

    x_ref : (T, C, HW)       bf16  full (fast) clip; slow pathway = even t only
    w1_ref: (2*hidden, C)    bf16  stacked conv weights, rows [0:H)=slow, [H:)=fast
    b1_ref: (2*hidden, 1)    f32   stacked conv bias
    w2_ref: (2*hidden, 128)  f32   stacked head, 1/N folded, slow cols [0:nc),
                                   fast cols [nc:2nc)
    b2_ref: (1, 128)         f32
    o_ref : (1, 128)         f32
    """
    t_frames, _, hw = x_ref.shape
    hidden = w1_ref.shape[0] // 2

    w1 = w1_ref[...]                      # (2H, C) bf16
    b1 = b1_ref[...]                      # (2H, 1) f32

    acc_s = jnp.zeros((hidden, hw), jnp.float32)
    acc_f = jnp.zeros((hidden, hw), jnp.float32)

    # Static loop over frames: each frame is a 256-lane chunk; conv + bias +
    # ReLU + pooled-partial accumulation stay in vregs (no materialized h).
    for t in range(t_frames):
        xt = x_ref[t]                     # (C, HW) bf16, lane-dense
        if t % 2 == 0:
            # Even frame: feeds both pathways -> one stacked matmul.
            h = jax.lax.dot_general(
                w1, xt, (((1,), (0,)), ((), ())),
                preferred_element_type=jnp.float32)        # (2H, HW)
            h = jnp.maximum(h + b1, 0.0)
            acc_s = acc_s + h[:hidden]
            acc_f = acc_f + h[hidden:]
        else:
            # Odd frame: fast pathway only.
            h = jax.lax.dot_general(
                w1[hidden:], xt, (((1,), (0,)), ((), ())),
                preferred_element_type=jnp.float32)        # (H, HW)
            acc_f = acc_f + jnp.maximum(h + b1[hidden:], 0.0)

    # One final lane reduction over pooled partials, then one fused head matmul
    # (contraction over the sublane axis of both operands -> (1, 128) logits).
    acc = jnp.concatenate([acc_s, acc_f], axis=0)          # (2H, HW)
    pooled = jnp.sum(acc, axis=-1, keepdims=True)          # (2H, 1)
    logits = jax.lax.dot_general(
        pooled, w2_ref[...], (((0,), (0,)), ((), ())),
        preferred_element_type=jnp.float32)                # (1, 128)
    o_ref[...] = (logits + b2_ref[...]).astype(o_ref.dtype)


@jax.jit
def slowfast_forward(x, params):
    """x: (B, T, C, H, W) float32 clip tensor (like the PyTorch module input)."""
    B, T, C, H, W = x.shape
    hidden = params["w1_s"].shape[1]
    nc = params["w2_s"].shape[1]
    assert 2 * nc <= _NC_PAD

    n_slow = (T + 1) // 2                 # number of frames in x[:, ::2]
    Ns = n_slow * H * W
    Nf = T * H * W

    # Single cheap layout change: merge H,W (contiguous -> free reshape) and
    # cast to bf16.  NO host transpose, NO duplicated slow clip.
    x_r = x.reshape(B, T, C, H * W).astype(jnp.bfloat16)

    # Stacked conv weight / bias: rows [0:hidden)=slow, [hidden:2*hidden)=fast.
    w1 = jnp.concatenate([params["w1_s"].T, params["w1_f"].T], axis=0)
    w1 = w1.astype(jnp.bfloat16)                                     # (2H, C)
    b1 = jnp.concatenate([params["b1_s"].reshape(hidden, 1),
                          params["b1_f"].reshape(hidden, 1)], axis=0)  # (2H, 1)

    # Stacked lane-padded head with the 1/N global-average folded in; slow
    # logits land in cols [0:nc), fast in [nc:2nc) == torch.cat([x_s, fuse], 1).
    w2 = jnp.zeros((2 * hidden, _NC_PAD), jnp.float32)
    w2 = w2.at[:hidden, :nc].set(params["w2_s"] * (1.0 / Ns))
    w2 = w2.at[hidden:, nc:2 * nc].set(params["w2_f"] * (1.0 / Nf))
    b2 = jnp.zeros((1, _NC_PAD), jnp.float32)
    b2 = b2.at[:, :nc].set(params["b2_s"])
    b2 = b2.at[:, nc:2 * nc].set(params["b2_f"])

    out = pl.pallas_call(
        _slowfast_kernel,
        out_shape=jax.ShapeDtypeStruct((B, 1, _NC_PAD), jnp.float32),
        grid=(B,),
        in_specs=[
            pl.BlockSpec((None, T, C, H * W), lambda b: (b, 0, 0, 0)),  # clip
            pl.BlockSpec((2 * hidden, C), lambda b: (0, 0)),            # w1
            pl.BlockSpec((2 * hidden, 1), lambda b: (0, 0)),            # b1
            pl.BlockSpec((2 * hidden, _NC_PAD), lambda b: (0, 0)),      # w2
            pl.BlockSpec((1, _NC_PAD), lambda b: (0, 0)),               # b2
        ],
        out_specs=pl.BlockSpec((None, 1, _NC_PAD), lambda b: (b, 0, 0)),
        compiler_params=pltpu.CompilerParams(
            dimension_semantics=("parallel",)),
    )(x_r, w1, b1, w2, b2)

    return out.reshape(B, _NC_PAD)[:, :2 * nc]   # (B, 2*nc) == cat([x_s, fuse], 1)


def _reference_forward(x, params):
    """Pure-jnp reference of the same computation (with matching bf16 quantization
    of activations/conv weights, f32 everywhere else)."""
    xq = x.astype(jnp.bfloat16).astype(jnp.float32)
    xp = jnp.transpose(xq, (0, 2, 1, 3, 4))     # (B, C, T, H, W)

    def flatten(p):
        B, C, T, H, W = p.shape
        return jnp.transpose(p, (0, 2, 3, 4, 1)).reshape(B, T * H * W, C)

    slow = flatten(xp[:, :, ::2, :, :])
    fast = flatten(xp)

    def pathway(xf_, w1, b1, w2, b2):
        w1q = w1.astype(jnp.bfloat16).astype(jnp.float32)
        h = jnp.einsum("bnc,ch->bnh", xf_, w1q,
                       precision=jax.lax.Precision.HIGHEST) + b1[None]
        h = jnp.maximum(h, 0.0)
        pooled = jnp.mean(h, axis=1)
        return jnp.dot(pooled, w2, precision=jax.lax.Precision.HIGHEST) + b2

    x_s = pathway(slow, params["w1_s"], params["b1_s"],
                  params["w2_s"], params["b2_s"])
    fuse = pathway(fast, params["w1_f"], params["b1_f"],
                   params["w2_f"], params["b2_f"])
    return jnp.concatenate([x_s, fuse], axis=1)


def make_params(key, in_channels, hidden, num_classes):
    ks = jax.random.split(key, 8)
    scale1 = 1.0 / jnp.sqrt(in_channels)
    scale2 = 1.0 / jnp.sqrt(hidden)
    return {
        "w1_s": jax.random.normal(ks[0], (in_channels, hidden), jnp.float32) * scale1,
        "b1_s": jax.random.normal(ks[1], (1, hidden), jnp.float32) * 0.01,
        "w2_s": jax.random.normal(ks[2], (hidden, num_classes), jnp.float32) * scale2,
        "b2_s": jax.random.normal(ks[3], (1, num_classes), jnp.float32) * 0.01,
        "w1_f": jax.random.normal(ks[4], (in_channels, hidden), jnp.float32) * scale1,
        "b1_f": jax.random.normal(ks[5], (1, hidden), jnp.float32) * 0.01,
        "w2_f": jax.random.normal(ks[6], (hidden, num_classes), jnp.float32) * scale2,
        "b2_f": jax.random.normal(ks[7], (1, num_classes), jnp.float32) * 0.01,
    }


if __name__ == "__main__":
    B, T, C, H, W = 2, 8, 4, 16, 16
    hidden, num_classes = 32, 8

    key = jax.random.PRNGKey(0)
    k_x, k_p = jax.random.split(key)
    x = jax.random.normal(k_x, (B, T, C, H, W), jnp.float32)
    params = make_params(k_p, C, hidden, num_classes)

    out = jax.block_until_ready(slowfast_forward(x, params))
    ref = jax.block_until_ready(_reference_forward(x, params))

    assert out.shape == (B, 2 * num_classes), out.shape
    if not jnp.allclose(out, ref, atol=1e-2, rtol=1e-2):
        raise AssertionError("Pallas kernel output does not match reference")

    print("KERNEL_OK")
</pallas_src>

<mosaic_0001>
module attributes {stable_mosaic.version = 11 : i64} {
  func.func @_slowfast_kernel(%arg0: i32, %arg1: memref<1x8x4x256xbf16, #tpu.memory_space<vmem>>, %arg2: memref<64x4xbf16, #tpu.memory_space<vmem>>, %arg3: memref<64x1xf32, #tpu.memory_space<vmem>>, %arg4: memref<64x128xf32, #tpu.memory_space<vmem>>, %arg5: memref<1x128xf32, #tpu.memory_space<vmem>>, %arg6: memref<1x1x128xf32, #tpu.memory_space<vmem>>) attributes {dimension_semantics = [#tpu.dimension_semantics<parallel>], iteration_bounds = array<i64: 2>, scalar_prefetch = 0 : i64, scratch_operands = 0 : i64, tpu.core_type = #tpu.core_type<tc>, window_params = [{transform_indices = @transform_0, window_bounds = array<i64: 1, 8, 4, 256>}, {pipeline_mode = #tpu.pipeline_mode<synchronous>, transform_indices = @transform_1, window_bounds = array<i64: 64, 4>}, {pipeline_mode = #tpu.pipeline_mode<synchronous>, transform_indices = @transform_2, window_bounds = array<i64: 64, 1>}, {pipeline_mode = #tpu.pipeline_mode<synchronous>, transform_indices = @transform_3, window_bounds = array<i64: 64, 128>}, {pipeline_mode = #tpu.pipeline_mode<synchronous>, transform_indices = @transform_4, window_bounds = array<i64: 1, 128>}, {transform_indices = @transform_5, window_bounds = array<i64: 1, 1, 128>}]} {
    %c0 = arith.constant 0 : index
    %c0_0 = arith.constant 0 : index
    %0 = vector.load %arg2[%c0, %c0_0] : memref<64x4xbf16, #tpu.memory_space<vmem>>, vector<64x4xbf16>
    %c0_1 = arith.constant 0 : index
    %c0_2 = arith.constant 0 : index
    %1 = vector.load %arg3[%c0_1, %c0_2] : memref<64x1xf32, #tpu.memory_space<vmem>>, vector<64x1xf32>
    %cst = arith.constant 0.000000e+00 : f32
    %2 = vector.broadcast %cst : f32 to vector<32x256xf32>
    %cst_3 = arith.constant 0.000000e+00 : f32
    %3 = vector.broadcast %cst_3 : f32 to vector<32x256xf32>
    %c0_4 = arith.constant 0 : index
    %c0_5 = arith.constant 0 : index
    %c0_6 = arith.constant 0 : index
    %c0_7 = arith.constant 0 : index
    %4 = vector.load %arg1[%c0_4, %c0_5, %c0_6, %c0_7] : memref<1x8x4x256xbf16, #tpu.memory_space<vmem>>, vector<1x1x4x256xbf16>
    %5 = vector.shape_cast %4 : vector<1x1x4x256xbf16> to vector<4x256xbf16>
    %cst_8 = arith.constant dense<0.000000e+00> : vector<64x256xf32>
    %6 = tpu.matmul %0, %5, %cst_8 {dimension_numbers = #tpu.dot_dimension_numbers<[1], [0], [0], [1], [0, 0, 1, 1], [], []>} : vector<64x4xbf16>, vector<4x256xbf16>, vector<64x256xf32> -> vector<64x256xf32>
    %7 = vector.broadcast %1 : vector<64x1xf32> to vector<64x256xf32>
    %8 = arith.addf %6, %7 : vector<64x256xf32>
    %cst_9 = arith.constant 0.000000e+00 : f32
    %9 = vector.broadcast %cst_9 : f32 to vector<64x256xf32>
    %10 = arith.maximumf %8, %9 : vector<64x256xf32>
    %11 = vector.extract_strided_slice %10 {offsets = [0, 0], sizes = [32, 256], strides = [1, 1]} : vector<64x256xf32> to vector<32x256xf32>
    %12 = arith.addf %2, %11 : vector<32x256xf32>
    %13 = vector.extract_strided_slice %10 {offsets = [32, 0], sizes = [32, 256], strides = [1, 1]} : vector<64x256xf32> to vector<32x256xf32>
    %14 = arith.addf %3, %13 : vector<32x256xf32>
    %c0_10 = arith.constant 0 : index
    %c1 = arith.constant 1 : index
    %c0_11 = arith.constant 0 : index
    %c0_12 = arith.constant 0 : index
    %15 = vector.load %arg1[%c0_10, %c1, %c0_11, %c0_12] : memref<1x8x4x256xbf16, #tpu.memory_space<vmem>>, vector<1x1x4x256xbf16>
    %16 = vector.shape_cast %15 : vector<1x1x4x256xbf16> to vector<4x256xbf16>
    %17 = vector.extract_strided_slice %0 {offsets = [32, 0], sizes = [32, 4], strides = [1, 1]} : vector<64x4xbf16> to vector<32x4xbf16>
    %cst_13 = arith.constant dense<0.000000e+00> : vector<32x256xf32>
    %18 = tpu.matmul %17, %16, %cst_13 {dimension_numbers = #tpu.dot_dimension_numbers<[1], [0], [0], [1], [0, 0, 1, 1], [], []>} : vector<32x4xbf16>, vector<4x256xbf16>, vector<32x256xf32> -> vector<32x256xf32>
    %19 = vector.extract_strided_slice %1 {offsets = [32, 0], sizes = [32, 1], strides = [1, 1]} : vector<64x1xf32> to vector<32x1xf32>
    %20 = vector.broadcast %19 : vector<32x1xf32> to vector<32x256xf32>
    %21 = arith.addf %18, %20 : vector<32x256xf32>
    %cst_14 = arith.constant 0.000000e+00 : f32
    %22 = vector.broadcast %cst_14 : f32 to vector<32x256xf32>
    %23 = arith.maximumf %21, %22 : vector<32x256xf32>
    %24 = arith.addf %14, %23 : vector<32x256xf32>
    %c0_15 = arith.constant 0 : index
    %c2 = arith.constant 2 : index
    %c0_16 = arith.constant 0 : index
    %c0_17 = arith.constant 0 : index
    %25 = vector.load %arg1[%c0_15, %c2, %c0_16, %c0_17] : memref<1x8x4x256xbf16, #tpu.memory_space<vmem>>, vector<1x1x4x256xbf16>
    %26 = vector.shape_cast %25 : vector<1x1x4x256xbf16> to vector<4x256xbf16>
    %cst_18 = arith.constant dense<0.000000e+00> : vector<64x256xf32>
    %27 = tpu.matmul %0, %26, %cst_18 {dimension_numbers = #tpu.dot_dimension_numbers<[1], [0], [0], [1], [0, 0, 1, 1], [], []>} : vector<64x4xbf16>, vector<4x256xbf16>, vector<64x256xf32> -> vector<64x256xf32>
    %28 = vector.broadcast %1 : vector<64x1xf32> to vector<64x256xf32>
    %29 = arith.addf %27, %28 : vector<64x256xf32>
    %cst_19 = arith.constant 0.000000e+00 : f32
    %30 = vector.broadcast %cst_19 : f32 to vector<64x256xf32>
    %31 = arith.maximumf %29, %30 : vector<64x256xf32>
    %32 = vector.extract_strided_slice %31 {offsets = [0, 0], sizes = [32, 256], strides = [1, 1]} : vector<64x256xf32> to vector<32x256xf32>
    %33 = arith.addf %12, %32 : vector<32x256xf32>
    %34 = vector.extract_strided_slice %31 {offsets = [32, 0], sizes = [32, 256], strides = [1, 1]} : vector<64x256xf32> to vector<32x256xf32>
    %35 = arith.addf %24, %34 : vector<32x256xf32>
    %c0_20 = arith.constant 0 : index
    %c3 = arith.constant 3 : index
    %c0_21 = arith.constant 0 : index
    %c0_22 = arith.constant 0 : index
    %36 = vector.load %arg1[%c0_20, %c3, %c0_21, %c0_22] : memref<1x8x4x256xbf16, #tpu.memory_space<vmem>>, vector<1x1x4x256xbf16>
    %37 = vector.shape_cast %36 : vector<1x1x4x256xbf16> to vector<4x256xbf16>
    %38 = vector.extract_strided_slice %0 {offsets = [32, 0], sizes = [32, 4], strides = [1, 1]} : vector<64x4xbf16> to vector<32x4xbf16>
    %cst_23 = arith.constant dense<0.000000e+00> : vector<32x256xf32>
    %39 = tpu.matmul %38, %37, %cst_23 {dimension_numbers = #tpu.dot_dimension_numbers<[1], [0], [0], [1], [0, 0, 1, 1], [], []>} : vector<32x4xbf16>, vector<4x256xbf16>, vector<32x256xf32> -> vector<32x256xf32>
    %40 = vector.extract_strided_slice %1 {offsets = [32, 0], sizes = [32, 1], strides = [1, 1]} : vector<64x1xf32> to vector<32x1xf32>
    %41 = vector.broadcast %40 : vector<32x1xf32> to vector<32x256xf32>
    %42 = arith.addf %39, %41 : vector<32x256xf32>
    %cst_24 = arith.constant 0.000000e+00 : f32
    %43 = vector.broadcast %cst_24 : f32 to vector<32x256xf32>
    %44 = arith.maximumf %42, %43 : vector<32x256xf32>
    %45 = arith.addf %35, %44 : vector<32x256xf32>
    %c0_25 = arith.constant 0 : index
    %c4 = arith.constant 4 : index
    %c0_26 = arith.constant 0 : index
    %c0_27 = arith.constant 0 : index
    %46 = vector.load %arg1[%c0_25, %c4, %c0_26, %c0_27] : memref<1x8x4x256xbf16, #tpu.memory_space<vmem>>, vector<1x1x4x256xbf16>
    %47 = vector.shape_cast %46 : vector<1x1x4x256xbf16> to vector<4x256xbf16>
    %cst_28 = arith.constant dense<0.000000e+00> : vector<64x256xf32>
    %48 = tpu.matmul %0, %47, %cst_28 {dimension_numbers = #tpu.dot_dimension_numbers<[1], [0], [0], [1], [0, 0, 1, 1], [], []>} : vector<64x4xbf16>, vector<4x256xbf16>, vector<64x256xf32> -> vector<64x256xf32>
    %49 = vector.broadcast %1 : vector<64x1xf32> to vector<64x256xf32>
    %50 = arith.addf %48, %49 : vector<64x256xf32>
    %cst_29 = arith.constant 0.000000e+00 : f32
    %51 = vector.broadcast %cst_29 : f32 to vector<64x256xf32>
    %52 = arith.maximumf %50, %51 : vector<64x256xf32>
    %53 = vector.extract_strided_slice %52 {offsets = [0, 0], sizes = [32, 256], strides = [1, 1]} : vector<64x256xf32> to vector<32x256xf32>
    %54 = arith.addf %33, %53 : vector<32x256xf32>
    %55 = vector.extract_strided_slice %52 {offsets = [32, 0], sizes = [32, 256], strides = [1, 1]} : vector<64x256xf32> to vector<32x256xf32>
    %56 = arith.addf %45, %55 : vector<32x256xf32>
    %c0_30 = arith.constant 0 : index
    %c5 = arith.constant 5 : index
    %c0_31 = arith.constant 0 : index
    %c0_32 = arith.constant 0 : index
    %57 = vector.load %arg1[%c0_30, %c5, %c0_31, %c0_32] : memref<1x8x4x256xbf16, #tpu.memory_space<vmem>>, vector<1x1x4x256xbf16>
    %58 = vector.shape_cast %57 : vector<1x1x4x256xbf16> to vector<4x256xbf16>
    %59 = vector.extract_strided_slice %0 {offsets = [32, 0], sizes = [32, 4], strides = [1, 1]} : vector<64x4xbf16> to vector<32x4xbf16>
    %cst_33 = arith.constant dense<0.000000e+00> : vector<32x256xf32>
    %60 = tpu.matmul %59, %58, %cst_33 {dimension_numbers = #tpu.dot_dimension_numbers<[1], [0], [0], [1], [0, 0, 1, 1], [], []>} : vector<32x4xbf16>, vector<4x256xbf16>, vector<32x256xf32> -> vector<32x256xf32>
    %61 = vector.extract_strided_slice %1 {offsets = [32, 0], sizes = [32, 1], strides = [1, 1]} : vector<64x1xf32> to vector<32x1xf32>
    %62 = vector.broadcast %61 : vector<32x1xf32> to vector<32x256xf32>
    %63 = arith.addf %60, %62 : vector<32x256xf32>
    %cst_34 = arith.constant 0.000000e+00 : f32
    %64 = vector.broadcast %cst_34 : f32 to vector<32x256xf32>
    %65 = arith.maximumf %63, %64 : vector<32x256xf32>
    %66 = arith.addf %56, %65 : vector<32x256xf32>
    %c0_35 = arith.constant 0 : index
    %c6 = arith.constant 6 : index
    %c0_36 = arith.constant 0 : index
    %c0_37 = arith.constant 0 : index
    %67 = vector.load %arg1[%c0_35, %c6, %c0_36, %c0_37] : memref<1x8x4x256xbf16, #tpu.memory_space<vmem>>, vector<1x1x4x256xbf16>
    %68 = vector.shape_cast %67 : vector<1x1x4x256xbf16> to vector<4x256xbf16>
    %cst_38 = arith.constant dense<0.000000e+00> : vector<64x256xf32>
    %69 = tpu.matmul %0, %68, %cst_38 {dimension_numbers = #tpu.dot_dimension_numbers<[1], [0], [0], [1], [0, 0, 1, 1], [], []>} : vector<64x4xbf16>, vector<4x256xbf16>, vector<64x256xf32> -> vector<64x256xf32>
    %70 = vector.broadcast %1 : vector<64x1xf32> to vector<64x256xf32>
    %71 = arith.addf %69, %70 : vector<64x256xf32>
    %cst_39 = arith.constant 0.000000e+00 : f32
    %72 = vector.broadcast %cst_39 : f32 to vector<64x256xf32>
    %73 = arith.maximumf %71, %72 : vector<64x256xf32>
    %74 = vector.extract_strided_slice %73 {offsets = [0, 0], sizes = [32, 256], strides = [1, 1]} : vector<64x256xf32> to vector<32x256xf32>
    %75 = arith.addf %54, %74 : vector<32x256xf32>
    %76 = vector.extract_strided_slice %73 {offsets = [32, 0], sizes = [32, 256], strides = [1, 1]} : vector<64x256xf32> to vector<32x256xf32>
    %77 = arith.addf %66, %76 : vector<32x256xf32>
    %c0_40 = arith.constant 0 : index
    %c7 = arith.constant 7 : index
    %c0_41 = arith.constant 0 : index
    %c0_42 = arith.constant 0 : index
    %78 = vector.load %arg1[%c0_40, %c7, %c0_41, %c0_42] : memref<1x8x4x256xbf16, #tpu.memory_space<vmem>>, vector<1x1x4x256xbf16>
    %79 = vector.shape_cast %78 : vector<1x1x4x256xbf16> to vector<4x256xbf16>
    %80 = vector.extract_strided_slice %0 {offsets = [32, 0], sizes = [32, 4], strides = [1, 1]} : vector<64x4xbf16> to vector<32x4xbf16>
    %cst_43 = arith.constant dense<0.000000e+00> : vector<32x256xf32>
    %81 = tpu.matmul %80, %79, %cst_43 {dimension_numbers = #tpu.dot_dimension_numbers<[1], [0], [0], [1], [0, 0, 1, 1], [], []>} : vector<32x4xbf16>, vector<4x256xbf16>, vector<32x256xf32> -> vector<32x256xf32>
    %82 = vector.extract_strided_slice %1 {offsets = [32, 0], sizes = [32, 1], strides = [1, 1]} : vector<64x1xf32> to vector<32x1xf32>
    %83 = vector.broadcast %82 : vector<32x1xf32> to vector<32x256xf32>
    %84 = arith.addf %81, %83 : vector<32x256xf32>
    %cst_44 = arith.constant 0.000000e+00 : f32
    %85 = vector.broadcast %cst_44 : f32 to vector<32x256xf32>
    %86 = arith.maximumf %84, %85 : vector<32x256xf32>
    %87 = arith.addf %77, %86 : vector<32x256xf32>
    %88 = tpu.concatenate %75, %87 in 0 : vector<32x256xf32>, vector<32x256xf32> -> vector<64x256xf32>
    %cst_45 = arith.constant dense<0.000000e+00> : vector<64xf32>
    %89 = vector.multi_reduction <add>, %88, %cst_45 [1] : vector<64x256xf32> to vector<64xf32>
    %90 = vector.shape_cast %89 : vector<64xf32> to vector<64x1xf32>
    %c0_46 = arith.constant 0 : index
    %c0_47 = arith.constant 0 : index
    %91 = vector.load %arg4[%c0_46, %c0_47] : memref<64x128xf32, #tpu.memory_space<vmem>>, vector<64x128xf32>
    %cst_48 = arith.constant dense<0.000000e+00> : vector<1x128xf32>
    %92 = tpu.matmul %90, %91, %cst_48 {dimension_numbers = #tpu.dot_dimension_numbers<[0], [0], [1], [1], [0, 1, 1, 1], [], []>} : vector<64x1xf32>, vector<64x128xf32>, vector<1x128xf32> -> vector<1x128xf32>
    %c0_49 = arith.constant 0 : index
    %c0_50 = arith.constant 0 : index
    %93 = vector.load %arg5[%c0_49, %c0_50] : memref<1x128xf32, #tpu.memory_space<vmem>>, vector<1x128xf32>
    %94 = arith.addf %92, %93 : vector<1x128xf32>
    %c0_51 = arith.constant 0 : index
    %c0_52 = arith.constant 0 : index
    %c0_53 = arith.constant 0 : index
    %95 = vector.load %arg6[%c0_51, %c0_52, %c0_53] : memref<1x1x128xf32, #tpu.memory_space<vmem>>, vector<1x1x128xf32>
    %96 = vector.shape_cast %95 : vector<1x1x128xf32> to vector<1x128xf32>
    %97 = vector.shape_cast %94 : vector<1x128xf32> to vector<1x1x128xf32>
    tpu.vector_store %arg6[%c0_51, %c0_52, %c0_53], %97 {strides = array<i32>} : memref<1x1x128xf32, #tpu.memory_space<vmem>>, vector<1x1x128xf32>,
    return
  }
  func.func @transform_0(%arg0: i32) -> (i32, i32, i32, i32) {
    %c0_i32 = arith.constant 0 : i32
    %c0_i32_0 = arith.constant 0 : i32
    %c0_i32_1 = arith.constant 0 : i32
    %c0_i32_2 = arith.constant 0 : i32
    return %arg0, %c0_i32, %c0_i32_0, %c0_i32_1 : i32, i32, i32, i32
  }
  func.func @transform_1(%arg0: i32) -> (i32, i32) {
    %c0_i32 = arith.constant 0 : i32
    %c0_i32_0 = arith.constant 0 : i32
    %c0_i32_1 = arith.constant 0 : i32
    return %c0_i32, %c0_i32_0 : i32, i32
  }
  func.func @transform_2(%arg0: i32) -> (i32, i32) {
    %c0_i32 = arith.constant 0 : i32
    %c0_i32_0 = arith.constant 0 : i32
    %c0_i32_1 = arith.constant 0 : i32
    return %c0_i32, %c0_i32_0 : i32, i32
  }
  func.func @transform_3(%arg0: i32) -> (i32, i32) {
    %c0_i32 = arith.constant 0 : i32
    %c0_i32_0 = arith.constant 0 : i32
    %c0_i32_1 = arith.constant 0 : i32
    return %c0_i32, %c0_i32_0 : i32, i32
  }
  func.func @transform_4(%arg0: i32) -> (i32, i32) {
    %c0_i32 = arith.constant 0 : i32
    %c0_i32_0 = arith.constant 0 : i32
    %c0_i32_1 = arith.constant 0 : i32
    return %c0_i32, %c0_i32_0 : i32, i32
  }
  func.func @transform_5(%arg0: i32) -> (i32, i32, i32) {
    %c0_i32 = arith.constant 0 : i32
    %c0_i32_0 = arith.constant 0 : i32
    %c0_i32_1 = arith.constant 0 : i32
    return %arg0, %c0_i32, %c0_i32_0 : i32, i32, i32
  }
}

</mosaic_0001>

<bundles_post_ra>
// kernel: slowfast_forward.1
= control target key start
LH: loop header
LB: loop body
LE: loop exit
PB: predicated region body
PF: predicated region fallthrough
CT: control target
= control target key end

     0   :  { %10 = vsyncpa [#allocation3], 0  ;;  %s2132_s0 = inlined_call_operand.vmem [shape: bf16[2,8,4,256], index: 0, kind: input, shape index: {}]   ;;  %s2133_s1 = inlined_call_operand.vmem [shape: bf16[64,4], index: 1, kind: input, shape index: {}]   ;;  %s2134_s2 = inlined_call_operand.vmem [shape: f32[64,1], index: 2, kind: input, shape index: {}]   ;;  %s2135_s3 = inlined_call_operand.vmem [shape: f32[64,128], index: 3, kind: input, shape index: {}]   ;;  %s2136_s4 = inlined_call_operand.vmem [shape: f32[1,128], index: 4, kind: input, shape index: {}]   ;;  %s2137_s5 = inlined_call_operand.hbm [shape: f32[2,1,128], index: 5, kind: output, shape index: {}]  }
   0x1   :  { %12 = vsyncpa [#allocation3 + $0x1], 0  ;;  %s1586_s18 = smov 0   ;;  %s1588_s19 = smov 0  }
   0x2   :  { %s1590_s20 = smov 0   ;;  %s1592_s21 = smov 0  }
   0x3 LB: > { %s1607_s22 = sadd.s32 4294967295, %s1550_s21   ;;  %s1352_s23 = sadd.s32 4294967294, %s1550_s21   ;;  %s1550_s21 = sphi %s1592_s21, %s2151_s21   ;;  %s1546_s20 = sphi %s1590_s20, %s2150_s20   ;;  %s1542_s19 = sphi %s1588_s19, %s2149_s19   ;;  %s1538_s18 = sphi %s1586_s18, %s2148_s18  }
   0x4   : > { %s1611_s24 = sadd.s32 1, %s1550_s21   ;;  %s135_s25 = sadd.s32 1, %s1546_s20 }
   0x5   : > { %s132_s26 = ssub.s32 %s1550_s21, %s1611_s24  ;;  %p145_p0 = scmp.ne.s32.totalorder %s1546_s20, %s1542_s19 }
   0x6   : > { %p133_p1 = scmp.eq.s32.totalorder %s132_s26, 0  ;;  %p146_p2 = scmp.eq.s32.totalorder %s1607_s22, 1 }
   0x7   : > { %p151_p3 = scmp.ne.s32.totalorder %s1542_s19, %s1538_s18  ;;  %p152_p4 = scmp.eq.s32.totalorder %s1352_s23, 1 }
   0x8   : > { %s1622_s27 = scalar_select %p133_p1, %s1546_s20, %s135_s25  }
   0x9   : > { %p1624_p5 = por %p146_p2, %p145_p0  ;;  %p1628_p6 = por %p152_p4, %p151_p3 }
   0xa   : > { %p1355_p7 = scmp.ge.s32.totalorder %s1550_s21, 1  ;;  %p190_p8 = scmp.lt.s32.totalorder %s1550_s21, 3 }
   0xc   : > { %p191_p9 = pnand %p1355_p7, %p190_p8 }
   0xe   : > { %194 = sbr.rel (%p191_p9) target bundleno = 773 (0x305), region = 40 }
  0x13   : > { %p217_p10 = scmp.lt.s32.totalorder %s1607_s22, 1  ;;  %v1552_v0 = vmov 0   ;;  %vm322_vm0 = vcmask 1041408   ;;  %v231_v1 = vld [vmem:[%s2134_s2] sm:$0xff]  ;;  %v232_v2 = vld [vmem:[%s2134_s2 + $0x8] sm:$0xff]  ;;  %vm309_vm1 = vcmask 31744  }
  0x14   : > { %361 = vmatprep.mubr.bf16.mxu0 %v1552_v0  ;;  %483 = vmatprep.mubr.bf16.mxu1 %v1552_v0  ;;  %v235_v4 = vld [vmem:[%s2134_s2 + $0x20] sm:$0xff]  ;;  %v236_v11 = vld [vmem:[%s2134_s2 + $0x28] sm:$0xff]  ;;  %v1673_v15 = vld [vmem:[%s2133_s1 + $0x10] sm:$0xff]   ;;  %vm1554_vm2 = vmmov 0   ;;  %vm1209_vm3 = vcmask 523264   ;;  %s1555_s14 = smov [#allocation2]  }
  0x15   : > { %s218_s30 = scalar_select %p217_p10, %s1607_s22, 1  ;;  %1484 = vset.pattern.permute.xlu0 %v1552_v0  ;;  %1485 = vset.pattern.permute.xlu1 %v1552_v0  ;;  %v1666_v12 = vld [vmem:[%s2133_s1] sm:$0xff]   ;;  %v233_v18 = vld [vmem:[%s2134_s2 + $0x10] sm:$0xff]  ;;  %v234_v25 = vld [vmem:[%s2134_s2 + $0x18] sm:$0xff] }
  0x16   : > { %242 = vperm.xlu0 %1484, %v231_v1   ;;  %247 = vperm.xlu1 %1485, %v232_v2   ;;  %v237_v24 = vld [vmem:[%s2134_s2 + $0x30] sm:$0xff]  ;;  %v1488_v26 = vld [vmem:[%s2133_s1 + $0x8] sm:$0xff]   ;;  %v1489_v27 = vld [vmem:[%s2133_s1 + $0x18] sm:$0xff]  }
  0x17   : > { %s1413_s6 = sshll.u32 %s218_s30, 5  ;;  %v238_v28 = vld [vmem:[%s2134_s2 + $0x38] sm:$0xff]  ;;  %s1410_s30 = sshll.u32 %s1607_s22, 4 }
  0x18   : > { %s1649_s13 = scalar_lea.vmem %s2132_s0, %s1413_s6  ;;  %s2097_s10 = scalar_lea.hbm %s2137_s5, %s1410_s30 }
  0x19   : > { %v1362_v3 = vld.sshfl [vmem:[%s1649_s13] sm:$0x33 pattern:$0x76325410]  ;;  %s1494_s22 = sshll.u32 %s1555_s14, 4  ;;  %s1495_s22 = int_to_ptr.vmem [resolvable:$false] %s1494_s22 }
  0x1a   : > { %v308_v5 = vcombine.high %v1362_v3, %v1362_v3  ;;  %v1369_v6 = vld.sshfl [vmem:[%s1649_s13 + $0x4] sm:$0x33 pattern:$0x76325410]  ;;  %v324_v7 = vsel %vm322_vm0, %v1362_v3, 0  ;;  %262 = vperm.xlu0 %1484, %v235_v4   ;;  %267 = vperm.xlu1 %1485, %v236_v11   ;;  %s1496_s15 = scalar_lea.vmem %s1495_s22, 32 }
  0x1b   : > { %v444_v8 = vcombine.high %v1369_v6, %v1369_v6  ;;  %v446_v9 = vsel %vm322_vm0, %v1369_v6, 0  ;;  %v1374_v10 = vld.sshfl [vmem:[%s1649_s13 + $0x8] sm:$0x33 pattern:$0x76325410] }
  0x1c   : > { %1363 = vmatprep.subr.msk.bf16.mxu0 %vm322_vm0, %v308_v5  ;;  %v530_v13 = vcombine.high %v1374_v10, %v1374_v10  ;;  %v1381_v14 = vld.sshfl [vmem:[%s1649_s13 + $0xc] sm:$0x33 pattern:$0x76325410]  ;;  %v532_v21 = vsel %vm322_vm0, %v1374_v10, 0 }
  0x1d   : > { %1370 = vmatprep.subr.msk.bf16.mxu1 %vm322_vm0, %v444_v8  ;;  %344 = vmatpush1.bf16.msra.mxu0 %v324_v7  ;;  %v652_v16 = vcombine.high %v1381_v14, %v1381_v14  ;;  %v1393_v17 = vld.sshfl [vmem:[%s1649_s13 + $0x14] sm:$0x33 pattern:$0x76325410]  ;;  %v654_v19 = vsel %vm322_vm0, %v1381_v14, 0 }
  0x1e   : > { %466 = vmatpush1.bf16.msra.mxu1 %v446_v9  ;;  %v1386_v20 = vld.sshfl [vmem:[%s1649_s13 + $0x10] sm:$0x33 pattern:$0x76325410]  ;;  %v860_v22 = vcombine.high %v1393_v17, %v1393_v17  ;;  %252 = vperm.xlu0 %1484, %v233_v18   ;;  %v862_v30 = vsel %vm322_vm0, %v1393_v17, 0 }
  0x1f   : > { %1375 = vmatprep.subr.msk.bf16.mxu1 %vm322_vm0, %v530_v13  ;;  %1382 = vmatprep.subr.msk.bf16.mxu0 %vm322_vm0, %v652_v16  ;;  %v738_v23 = vcombine.high %v1386_v20, %v1386_v20  ;;  %v1398_v29 = vld.sshfl [vmem:[%s1649_s13 + $0x18] sm:$0x33 pattern:$0x76325410]  ;;  %v740_v33 = vsel %vm322_vm0, %v1386_v20, 0 }
  0x20   : > { %1364 = vmatmul.mubr.msk.bf16.vlgmr.msra.gmra.mxu0 %vm309_vm1, %v1666_v12  ;;  %272 = vperm.xlu1 %1485, %v237_v24   ;;  %v946_v31 = vcombine.high %v1398_v29, %v1398_v29  ;;  %v1405_v32 = vld.sshfl [vmem:[%s1649_s13 + $0x1c] sm:$0x33 pattern:$0x76325410]  ;;  %v948_v36 = vsel %vm322_vm0, %v1398_v29, 0  ;;  %s215_s13 = sand.u32 1, %s1542_s19  }
  0x21   : > { %1371 = vmatmul.mubr.msk.bf16.vlgmr.msra.gmra.mxu1 %vm309_vm1, %v1673_v15  ;;  %674 = vmatpush1.bf16.msra.mxu0 %v654_v19  ;;  %v1068_v34 = vcombine.high %v1405_v32, %v1405_v32  ;;  %v1070_v35 = vsel %vm322_vm0, %v1405_v32, 0  ;;  %s216_s6 = scalar_lea.vmem [#allocation2], %s215_s13  ;;  %s1285_s11 = scalar_lea.sflag [#allocation3], %s215_s13 }
  0x22   : > { %552 = vmatpush1.bf16.msra.mxu1 %v532_v21  ;;  %371 = vmatprep.mubr.bf16.mxu0 %v1552_v0  ;;  %s1297_s7 = sshll.u32 %s216_s6, 4  ;;  %s1298_s7 = int_to_ptr.vmem [resolvable:$true] %s1297_s7 }
  0x23   : > { %493 = vmatprep.mubr.bf16.mxu1 %v1552_v0  ;;  %1394 = vmatprep.subr.msk.bf16.mxu1 %vm322_vm0, %v860_v22  ;;  %s1490_s12 = scalar_lea.vmem %s1298_s7, 16  ;;  %p1497_p0 = scmp.lt.s32.totalorder %s1298_s7, %s1495_s22 }
  0x24   : > { %1387 = vmatprep.subr.msk.bf16.mxu0 %vm322_vm0, %v738_v23  ;;  %257 = vperm.xlu0 %1484, %v234_v25   ;;  %p1491_p11 = scmp.ne.s32.totalorder %s1298_s7, %s1490_s12  ;;  %p1498_p1 = scmp.lt.s32.totalorder %s1496_s15, %s1490_s12 }
  0x25   : > { %277 = vperm.xlu1 %1485, %v238_v28  }
  0x26   : > { %p1492_p12 = pnand %p1491_p11, %p1624_p5  ;;  %p1499_p2 = por %p1498_p1, %p1497_p0 }
  0x28   : > { %1365 = vmatmul.mubr.msk.bf16.gmra.mxu0 %vm309_vm1, %v1488_v26  ;;  %p1493_p13 = pneg %p1492_p12 }
  0x29   : > { %1372 = vmatmul.mubr.msk.bf16.gmra.mxu1 %vm309_vm1, %v1489_v27  ;;  %381 = vmatprep.mubr.bf16.mxu0 %v1552_v0 }
  0x2a   : > { %569 = vmatprep.mubr.bf16.mxu1 %v1552_v0  ;;  %p1500_p3 = pnand %p1499_p2, %p1493_p13 }
  0x30   : > { %1366 = vmatmul.mubr.msk.bf16.gmra.mxu0 %vm309_vm1, %v1673_v15 }
  0x31   : > { %1376 = vmatmul.mubr.msk.bf16.vlgmr.msra.gmra.mxu1 %vm309_vm1, %v1666_v12  ;;  %391 = vmatprep.mubr.bf16.mxu0 %v1552_v0 }
  0x32   : > { %882 = vmatpush1.bf16.msra.mxu1 %v862_v30  ;;  %579 = vmatprep.mubr.bf16.mxu1 %v1552_v0 }
  0x33   : > { %1399 = vmatprep.subr.msk.bf16.mxu1 %vm322_vm0, %v946_v31 }
  0x38   : > { %1367 = vmatmul.mubr.msk.bf16.gmra.mxu0 %vm309_vm1, %v1489_v27 }
  0x39   : > { %1377 = vmatmul.mubr.msk.bf16.gmra.mxu1 %vm309_vm1, %v1488_v26  ;;  %691 = vmatprep.mubr.bf16.mxu0 %v1552_v0 }
  0x3a   : > { %589 = vmatprep.mubr.bf16.mxu1 %v1552_v0 }
  0x40   : > { %1383 = vmatmul.mubr.msk.bf16.vlgmr.msra.gmra.mxu0 %vm309_vm1, %v1673_v15 }
  0x41   : > { %1378 = vmatmul.mubr.msk.bf16.gmra.mxu1 %vm309_vm1, %v1673_v15  ;;  %760 = vmatpush1.bf16.msra.mxu0 %v740_v33 }
  0x42   : > { %599 = vmatprep.mubr.bf16.mxu1 %v1552_v0  ;;  %701 = vmatprep.mubr.bf16.mxu0 %v1552_v0 }
  0x43   : > { %1406 = vmatprep.subr.msk.bf16.mxu0 %vm322_vm0, %v1068_v34 }
  0x48   : > { %1384 = vmatmul.mubr.msk.bf16.gmra.mxu0 %vm309_vm1, %v1489_v27 }
  0x49   : > { %1379 = vmatmul.mubr.msk.bf16.gmra.mxu1 %vm309_vm1, %v1489_v27  ;;  %777 = vmatprep.mubr.bf16.mxu0 %v1552_v0 }
  0x4a   : > { %899 = vmatprep.mubr.bf16.mxu1 %v1552_v0 }
  0x50   : > { %1388 = vmatmul.mubr.msk.bf16.vlgmr.msra.gmra.mxu0 %vm309_vm1, %v1666_v12 }
  0x51   : > { %1395 = vmatmul.mubr.msk.bf16.vlgmr.msra.gmra.mxu1 %vm309_vm1, %v1673_v15  ;;  %1090 = vmatpush1.bf16.msra.mxu0 %v1070_v35 }
  0x52   : > { %968 = vmatpush1.bf16.msra.mxu1 %v948_v36  ;;  %787 = vmatprep.mubr.bf16.mxu0 %v1552_v0 }
  0x53   : > { %909 = vmatprep.mubr.bf16.mxu1 %v1552_v0 }
  0x58   : > { %1389 = vmatmul.mubr.msk.bf16.gmra.mxu0 %vm309_vm1, %v1488_v26 }
  0x59   : > { %1396 = vmatmul.mubr.msk.bf16.gmra.mxu1 %vm309_vm1, %v1489_v27  ;;  %797 = vmatprep.mubr.bf16.mxu0 %v1552_v0 }
  0x5a   : > { %985 = vmatprep.mubr.bf16.mxu1 %v1552_v0 }
  0x60   : > { %1390 = vmatmul.mubr.msk.bf16.gmra.mxu0 %vm309_vm1, %v1673_v15 }
  0x61   : > { %1400 = vmatmul.mubr.msk.bf16.vlgmr.msra.gmra.mxu1 %vm309_vm1, %v1666_v12  ;;  %807 = vmatprep.mubr.bf16.mxu0 %v1552_v0 }
  0x62   : > { %995 = vmatprep.mubr.bf16.mxu1 %v1552_v0 }
  0x68   : > { %1391 = vmatmul.mubr.msk.bf16.gmra.mxu0 %vm309_vm1, %v1489_v27 }
  0x69   : > { %1401 = vmatmul.mubr.msk.bf16.gmra.mxu1 %vm309_vm1, %v1488_v26  ;;  %1107 = vmatprep.mubr.bf16.mxu0 %v1552_v0 }
  0x6a   : > { %1005 = vmatprep.mubr.bf16.mxu1 %v1552_v0 }
  0x70   : > { %1407 = vmatmul.mubr.msk.bf16.vlgmr.msra.gmra.mxu0 %vm309_vm1, %v1673_v15 }
  0x71   : > { %1402 = vmatmul.mubr.msk.bf16.gmra.mxu1 %vm309_vm1, %v1673_v15  ;;  %1117 = vmatprep.mubr.bf16.mxu0 %v1552_v0 }
  0x72   : > { %1015 = vmatprep.mubr.bf16.mxu1 %v1552_v0 }
  0x78   : > { %1408 = vmatmul.mubr.msk.bf16.gmra.mxu0 %vm309_vm1, %v1489_v27 }
  0x79   : > { %1403 = vmatmul.mubr.msk.bf16.gmra.mxu1 %vm309_vm1, %v1489_v27 }
  0x91   : > { %v1767_v51 = vpop.permute.xlu0 %242  ;;  %v1769_v53 = vpop.permute.xlu1 %247 }
  0x95   : > { %v1771_v59 = vpop.permute.xlu0 %262  ;;  %v1773_v61 = vpop.permute.xlu1 %267 }
  0x99   : > { %v1775_v2 = vpop.permute.xlu0 %252 }
  0x9a   : > { %2142 = vst [vmem:[#allocation5_spill] sm:$0xff] %v1775_v2 }
  0x9b   : > { %v1779_v5 = vpop.permute.xlu1 %272 }
  0x9f   : > { %v1810_v17 = vpop.permute.xlu0 %257 }
  0xa0   : > { %v1831_v27 = vpop.permute.xlu1 %277 }
  0xe0   : > { %v363_v37 = vpop.f32.mrf.mxu0 }
  0xe1   : > { %v485_v38 = vpop.f32.mrf.mxu1  ;;  %v1784_v7 = vadd.f32 %v363_v37, %v1767_v51 }
  0xe2   : > { %v365_v39 = vpop.f32.mrf.mxu0  ;;  %v1795_v11 = vadd.f32 %v485_v38, %v1771_v59 }
  0xe3   : > { %v487_v40 = vpop.f32.mrf.mxu1  ;;  %v1789_v9 = vadd.f32 %v365_v39, %v1767_v51  ;;  %v402_v19 = vmax.f32 %v1784_v7, 0.0 }
  0xe4   : > { %v367_v41 = vpop.f32.mrf.mxu0  ;;  %v1792_v10 = vadd.f32 %v487_v40, %v1771_v59  ;;  %v504_v28 = vmax.f32 %v1795_v11, 0.0 }
  0xe5   : > { %v489_v42 = vpop.f32.mrf.mxu1  ;;  %v1800_v13 = vadd.f32 %v367_v41, %v1769_v53  ;;  %v403_v24 = vmax.f32 %v1789_v9, 0.0 }
  0xe6   : > { %v369_v43 = vpop.f32.mrf.mxu0  ;;  %v1803_v14 = vadd.f32 %v489_v42, %v1773_v61  ;;  %v505_v25 = vmax.f32 %v1792_v10, 0.0 }
  0xe7   : > { %v491_v44 = vpop.f32.mrf.mxu1  ;;  %v1808_v16 = vadd.f32 %v369_v43, %v1769_v53  ;;  %v404_v30 = vmax.f32 %v1800_v13, 0.0 }
  0xe8   : > { %v373_v45 = vpop.f32.mrf.mxu0  ;;  %v1816_v20 = vadd.f32 %v491_v44, %v1773_v61  ;;  %v506_v31 = vmax.f32 %v1803_v14, 0.0 }
  0xe9   : > { %v495_v46 = vpop.f32.mrf.mxu1  ;;  %v1819_v21 = vadd.f32 %v373_v45, %v1775_v2 }
  0xea   : > { %v375_v47 = vpop.f32.mrf.mxu0  ;;  %v1822_v22 = vadd.f32 %v495_v46, %v1779_v5  ;;  %v507_v40 = vmax.f32 %v1816_v20, 0.0 }
  0xeb   : > { %v497_v48 = vpop.f32.mrf.mxu1  ;;  %v1829_v26 = vadd.f32 %v375_v47, %v1775_v2  ;;  %v406_v41 = vmax.f32 %v1819_v21, 0.0 }
  0xec   : > { %v377_v49 = vpop.f32.mrf.mxu0  ;;  %v1837_v32 = vadd.f32 %v497_v48, %v1779_v5  ;;  %v508_v42 = vmax.f32 %v1822_v22, 0.0 }
  0xed   : > { %v499_v50 = vpop.f32.mrf.mxu1  ;;  %v1840_v33 = vadd.f32 %v377_v49, %v1810_v17 }
  0xee   : > { %v379_v52 = vpop.f32.mrf.mxu0  ;;  %v1852_v43 = vadd.f32 %v499_v50, %v1831_v27 }
  0xef   : > { %v501_v54 = vpop.f32.mrf.mxu1  ;;  %v1858_v46 = vadd.f32 %v379_v52, %v1810_v17 }
  0xf0   : > { %v383_v55 = vpop.f32.mrf.mxu0 }
  0xf1   : > { %v571_v56 = vpop.f32.mrf.mxu1  ;;  %v384_v36 = vadd.f32 %v383_v55, %v1771_v59  ;;  %v509_v55 = vmax.f32 %v1837_v32, 0.0 }
  0xf2   : > { %v385_v57 = vpop.f32.mrf.mxu0  ;;  %v572_v37 = vadd.f32 %v571_v56, %v1767_v51 }
  0xf3   : > { %v573_v58 = vpop.f32.mrf.mxu1  ;;  %v386_v38 = vadd.f32 %v385_v57, %v1771_v59  ;;  %v1865_v57 = vadd.f32 %v501_v54, %v1831_v27  ;;  %v410_v9 = vmax.f32 %v384_v36, 0.0 }
  0xf4   : > { %v387_v60 = vpop.f32.mrf.mxu0  ;;  %v574_v47 = vadd.f32 %v573_v58, %v1767_v51  ;;  %v610_v10 = vmax.f32 %v572_v37, 0.0 }
  0xf5   : > { %v575_v62 = vpop.f32.mrf.mxu1  ;;  %v388_v48 = vadd.f32 %v387_v60, %v1773_v61  ;;  %v411_v52 = vmax.f32 %v386_v38, 0.0  ;;  %v510_v60 = vmax.f32 %v1852_v43, 0.0  ;;  %v512_v38 = vadd.f32 %v504_v28, %v410_v9 }
  0xf6   : > { %v389_v63 = vpop.f32.mrf.mxu0  ;;  %v576_v50 = vadd.f32 %v575_v62, %v1769_v53  ;;  %v611_v21 = vmax.f32 %v574_v47, 0.0  ;;  %v1887_v43 = vadd.f32 %v610_v10, %v402_v19 }
  0xf7   : > { %v577_v0 = vpop.f32.mrf.mxu1  ;;  %v390_v11 = vadd.f32 %v389_v63, %v1773_v61  ;;  %v412_v22 = vmax.f32 %v388_v48, 0.0  ;;  %v511_v63 = vmax.f32 %v1865_v57, 0.0  ;;  %v513_v47 = vadd.f32 %v505_v25, %v411_v52 }
  0xf8   : > { %v393_v1 = vpop.f32.mrf.mxu0  ;;  %v578_v13 = vadd.f32 %v577_v0, %v1769_v53  ;;  %v612_v37 = vmax.f32 %v576_v50, 0.0 }
  0xf9   : > { %v581_v3 = vpop.f32.mrf.mxu1  ;;  %v394_v14 = vadd.f32 %v393_v1, %v1779_v5  ;;  %v413_v48 = vmax.f32 %v390_v11, 0.0  ;;  %v514_v35 = vadd.f32 %v506_v31, %v412_v22 }
  0xfa   : > { %v1777_v4 = vpop.f32.mrf.mxu0  ;;  %v582_v20 = vadd.f32 %v581_v3, %v1775_v2  ;;  %v613_v56 = vmax.f32 %v578_v13, 0.0  ;;  %v1896_v19 = vadd.f32 %v612_v37, %v404_v30 }
  0xfb   : > { %v1781_v6 = vpop.f32.mrf.mxu1  ;;  %v396_v32 = vadd.f32 %v1777_v4, %v1779_v5  ;;  %v414_v4 = vmax.f32 %v394_v14, 0.0  ;;  %v515_v11 = vadd.f32 %v507_v40, %v413_v48 }
  0xfc   : > { %v1786_v8 = vpop.f32.mrf.mxu0  ;;  %v584_v0 = vadd.f32 %v1781_v6, %v1775_v2  ;;  %v614_v45 = vmax.f32 %v582_v20, 0.0  ;;  %v1893_v6 = vadd.f32 %v611_v21, %v403_v24 }
  0xfd   : > { %v1797_v12 = vpop.f32.mrf.mxu1  ;;  %v398_v1 = vadd.f32 %v1786_v8, %v1831_v27  ;;  %v415_v8 = vmax.f32 %v396_v32, 0.0  ;;  %v516_v14 = vadd.f32 %v508_v42, %v414_v4 }
  0xfe   : > { %v1805_v15 = vpop.f32.mrf.mxu0  ;;  %v586_v57 = vadd.f32 %v1797_v12, %v1810_v17  ;;  %v615_v25 = vmax.f32 %v584_v0, 0.0  ;;  %v1910_v20 = vadd.f32 %v614_v45, %v406_v41 }
  0xff   : > { %v1812_v18 = vpop.f32.mrf.mxu1  ;;  %v416_v9 = vmax.f32 %v398_v1, 0.0  ;;  %v400_v10 = vadd.f32 %v1805_v15, %v1831_v27  ;;  %v517_v22 = vadd.f32 %v509_v55, %v415_v8 }
 0x100   : > { %v1824_v23 = vpop.f32.mrf.mxu0  ;;  %v588_v12 = vadd.f32 %v1812_v18, %v1810_v17  ;;  %v616_v21 = vmax.f32 %v586_v57, 0.0 }
 0x101   : > { %v591_v29 = vpop.f32.mrf.mxu1  ;;  %v694_v40 = vadd.f32 %v1824_v23, %v1771_v59  ;;  %v2145_v23 = vmax.f32 %v1840_v33, 0.0 }
 0x102   : > { %v1842_v34 = vpop.f32.mrf.mxu0  ;;  %v592_v2 = vadd.f32 %v591_v29, %v1771_v59  ;;  %v2143_v29 = vmax.f32 %v1808_v16, 0.0  ;;  %v518_v16 = vadd.f32 %v510_v60, %v416_v9  ;;  %v617_v45 = vmax.f32 %v588_v12, 0.0 }
 0x103   : > { %v593_v39 = vpop.f32.mrf.mxu1  ;;  %v712_v57 = vmax.f32 %v694_v40, 0.0 }
 0x104   : > { %v1854_v44 = vpop.f32.mrf.mxu0  ;;  %v594_v24 = vadd.f32 %v593_v39, %v1771_v59  ;;  %v1908_v30 = vadd.f32 %v613_v56, %v2143_v29  ;;  %v618_v32 = vmax.f32 %v592_v2, 0.0  ;;  %v417_v56 = vmax.f32 %v400_v10, 0.0 }
 0x105   : > { %v595_v49 = vpop.f32.mrf.mxu1  ;;  %v696_v2 = vadd.f32 %v1842_v34, %v1771_v59 }
 0x106   : > { %v1868_v7 = vpop.f32.mrf.mxu0  ;;  %v596_v31 = vadd.f32 %v595_v49, %v1773_v61  ;;  %v2144_v49 = vmax.f32 %v1829_v26, 0.0  ;;  %v619_v0 = vmax.f32 %v594_v24, 0.0  ;;  %v698_v26 = vadd.f32 %v1854_v44, %v1773_v61 }
 0x107   : > { %v597_v58 = vpop.f32.mrf.mxu1  ;;  %v634_v4 = vadd.f32 %v618_v32, %v512_v38  ;;  %v700_v34 = vadd.f32 %v1868_v7, %v1773_v61  ;;  %v519_v9 = vadd.f32 %v511_v63, %v417_v56  ;;  %v713_v38 = vmax.f32 %v696_v2, 0.0 }
 0x108   : > { %v1875_v54 = vpop.f32.mrf.mxu0  ;;  %v598_v18 = vadd.f32 %v597_v58, %v1773_v61  ;;  %v1917_v37 = vadd.f32 %v615_v25, %v2144_v49  ;;  %v620_v55 = vmax.f32 %v596_v31, 0.0  ;;  %v1924_v58 = vadd.f32 %v616_v21, %v2145_v23 }
 0x109   : > { %v601_v36 = vpop.f32.mrf.mxu1  ;;  %v704_v33 = vadd.f32 %v1875_v54, %v1779_v5  ;;  %v714_v21 = vmax.f32 %v698_v26, 0.0 }
 0x10a   : > { %v1885_v3 = vpop.f32.mrf.mxu0  ;;  %v602_v42 = vadd.f32 %v601_v36, %v1779_v5  ;;  %v621_v8 = vmax.f32 %v598_v18, 0.0  ;;  %v636_v31 = vadd.f32 %v620_v55, %v514_v35  ;;  %v1941_v18 = vadd.f32 %v712_v57, %v634_v4 }
 0x10b   : > { %v603_v62 = vpop.f32.mrf.mxu1  ;;  %v706_v7 = vadd.f32 %v1885_v3, %v1779_v5 }
 0x10c   : > { %v1891_v50 = vpop.f32.mrf.mxu0  ;;  %v604_v60 = vadd.f32 %v603_v62, %v1779_v5  ;;  %v622_v10 = vmax.f32 %v602_v42, 0.0  ;;  %v2146_v62 = vmax.f32 %v1858_v46, 0.0  ;;  %v637_v54 = vadd.f32 %v621_v8, %v515_v11 }
 0x10d   : > { %v605_v28 = vpop.f32.mrf.mxu1  ;;  %v716_v42 = vmax.f32 %v704_v33, 0.0  ;;  %v708_v35 = vadd.f32 %v1891_v50, %v1831_v27  ;;  %v1948_v2 = vadd.f32 %v714_v21, %v636_v31  ;;  %v2147_v33 = vld [vmem:[#allocation5_spill] sm:$0xff] }
 0x10e   : > { %v1900_v52 = vpop.f32.mrf.mxu0  ;;  %v606_v48 = vadd.f32 %v605_v28, %v1831_v27  ;;  %v1937_v24 = vadd.f32 %v617_v45, %v2146_v62  ;;  %v635_v28 = vadd.f32 %v619_v0, %v513_v47  ;;  %v623_v32 = vmax.f32 %v604_v60, 0.0 }
 0x10f   : > { %v607_v13 = vpop.f32.mrf.mxu1  ;;  %v638_v56 = vadd.f32 %v622_v10, %v516_v14  ;;  %v710_v3 = vadd.f32 %v1900_v52, %v1831_v27  ;;  %v718_v52 = vmax.f32 %v708_v35, 0.0 }
 0x110   : > { %v779_v15 = vpop.f32.mrf.mxu0  ;;  %v608_v12 = vadd.f32 %v607_v13, %v1831_v27  ;;  %v624_v63 = vmax.f32 %v606_v48, 0.0  ;;  %v715_v13 = vmax.f32 %v700_v34, 0.0  ;;  %v1946_v0 = vadd.f32 %v713_v38, %v635_v28 }
 0x111   : > { %v901_v39 = vpop.f32.mrf.mxu1  ;;  %v780_v49 = vadd.f32 %v779_v15, %v1767_v51  ;;  %v639_v23 = vadd.f32 %v623_v32, %v517_v22  ;;  %v717_v15 = vmax.f32 %v706_v7, 0.0  ;;  %v1960_v34 = vadd.f32 %v716_v42, %v638_v56 }
 0x112   : > { %v781_v41 = vpop.f32.mrf.mxu0  ;;  %v625_v47 = vmax.f32 %v608_v12, 0.0  ;;  %v640_v26 = vadd.f32 %v624_v63, %v518_v16  ;;  %v1954_v48 = vadd.f32 %v715_v13, %v637_v54  ;;  %v1957_v4 = vadd.f32 %v901_v39, %v1771_v59 }
 0x113   : > { %v903_v1 = vpop.f32.mrf.mxu1  ;;  %v782_v11 = vadd.f32 %v781_v41, %v1767_v51  ;;  %v818_v50 = vmax.f32 %v780_v49, 0.0  ;;  %v719_v10 = vmax.f32 %v710_v3, 0.0  ;;  %v1967_v39 = vadd.f32 %v717_v15, %v639_v23 }
 0x114   : > { %v783_v36 = vpop.f32.mrf.mxu0  ;;  %v641_v41 = vadd.f32 %v625_v47, %v519_v9  ;;  %v1963_v22 = vadd.f32 %v903_v1, %v1771_v59  ;;  %v1969_v38 = vadd.f32 %v718_v52, %v640_v26  ;;  %v920_v21 = vmax.f32 %v1957_v4, 0.0 }
 0x115   : > { %v905_v25 = vpop.f32.mrf.mxu1  ;;  %v784_v14 = vadd.f32 %v783_v36, %v1769_v53  ;;  %v819_v36 = vmax.f32 %v782_v11, 0.0  ;;  %v834_v1 = vadd.f32 %v818_v50, %v1887_v43 }
 0x116   : > { %v785_v44 = vpop.f32.mrf.mxu0  ;;  %v1972_v31 = vadd.f32 %v905_v25, %v1773_v61  ;;  %v921_v54 = vmax.f32 %v1963_v22, 0.0 }
 0x117   : > { %v907_v29 = vpop.f32.mrf.mxu1  ;;  %v786_v57 = vadd.f32 %v785_v44, %v1769_v53  ;;  %v820_v44 = vmax.f32 %v784_v14, 0.0  ;;  %v835_v56 = vadd.f32 %v819_v36, %v1893_v6 }
 0x118   : > { %v789_v40 = vpop.f32.mrf.mxu0  ;;  %v1977_v7 = vadd.f32 %v907_v29, %v1773_v61 }
 0x119   : > { %v911_v46 = vpop.f32.mrf.mxu1  ;;  %v790_v12 = vadd.f32 %v789_v40, %v2147_v33  ;;  %v821_v32 = vmax.f32 %v786_v57, 0.0  ;;  %v1979_v40 = vadd.f32 %v719_v10, %v641_v41  ;;  %v836_v47 = vadd.f32 %v820_v44, %v1896_v19 }
 0x11a   : > { %v791_v45 = vpop.f32.mrf.mxu0  ;;  %v1983_v13 = vadd.f32 %v911_v46, %v1779_v5  ;;  %v923_v15 = vmax.f32 %v1977_v7, 0.0 }
 0x11b   : > { %v913_v55 = vpop.f32.mrf.mxu1  ;;  %v792_v62 = vadd.f32 %v791_v45, %v2147_v33  ;;  %v822_v43 = vmax.f32 %v790_v12, 0.0  ;;  %v922_v45 = vmax.f32 %v1972_v31, 0.0  ;;  %v837_v23 = vadd.f32 %v821_v32, %v1908_v30 }
 0x11c   : > { %v793_v60 = vpop.f32.mrf.mxu0  ;;  %v1988_v35 = vadd.f32 %v913_v55, %v1779_v5  ;;  %v924_v55 = vmax.f32 %v1983_v13, 0.0 }
 0x11d   : > { %v915_v8 = vpop.f32.mrf.mxu1  ;;  %v823_v42 = vmax.f32 %v792_v62, 0.0  ;;  %v794_v6 = vadd.f32 %v793_v60, %v1810_v17 }
 0x11e   : > { %v795_v16 = vpop.f32.mrf.mxu0  ;;  %v1999_v50 = vadd.f32 %v915_v8, %v1831_v27  ;;  %v925_v41 = vmax.f32 %v1988_v35, 0.0 }
 0x11f   : > { %v917_v28 = vpop.f32.mrf.mxu1  ;;  %v839_v30 = vadd.f32 %v823_v42, %v1917_v37  ;;  %v796_v32 = vadd.f32 %v795_v16, %v1810_v17 }
 0x120   : > { %v799_v9 = vpop.f32.mrf.mxu0  ;;  %v926_v37 = vmax.f32 %v1999_v50, 0.0 }
 0x121   : > { %v987_v63 = vpop.f32.mrf.mxu1  ;;  %v800_v26 = vadd.f32 %v799_v9, %v1771_v59  ;;  %v824_v9 = vmax.f32 %v794_v6, 0.0 }
 0x122   : > { %v988_v25 = vadd.f32 %v987_v63, %v1767_v51  ;;  %v801_v49 = vpop.f32.mrf.mxu0 }
 0x123   : > { %v989_v29 = vpop.f32.mrf.mxu1  ;;  %v802_v60 = vadd.f32 %v801_v49, %v1771_v59  ;;  %v826_v63 = vmax.f32 %v800_v26, 0.0 }
 0x124   : > { %v1026_v3 = vmax.f32 %v988_v25, 0.0  ;;  %v990_v11 = vadd.f32 %v989_v29, %v1767_v51  ;;  %v803_v46 = vpop.f32.mrf.mxu0  ;;  %v838_v51 = vadd.f32 %v822_v43, %v1910_v20 }
 0x125   : > { %v991_v14 = vpop.f32.mrf.mxu1  ;;  %v804_v25 = vadd.f32 %v803_v46, %v1773_v61 }
 0x126   : > { %v1027_v19 = vmax.f32 %v990_v11, 0.0  ;;  %v992_v57 = vadd.f32 %v991_v14, %v1769_v53  ;;  %v805_v52 = vpop.f32.mrf.mxu0  ;;  %v1042_v36 = vadd.f32 %v1026_v3, %v834_v1  ;;  %v2012_v1 = vadd.f32 %v917_v28, %v1831_v27 }
 0x127   : > { %v993_v10 = vpop.f32.mrf.mxu1  ;;  %v828_v28 = vmax.f32 %v804_v25, 0.0 }
 0x128   : > { %v1043_v12 = vadd.f32 %v1027_v19, %v835_v56  ;;  %v1028_v62 = vmax.f32 %v992_v57, 0.0  ;;  %v994_v44 = vadd.f32 %v993_v10, %v1769_v53  ;;  %v809_v8 = vpop.f32.mrf.mxu0  ;;  %v827_v56 = vmax.f32 %v802_v60, 0.0 }
 0x129   : > { %v997_v20 = vpop.f32.mrf.mxu1  ;;  %v806_v53 = vadd.f32 %v805_v52, %v1773_v61  ;;  %v810_v3 = vadd.f32 %v809_v8, %v1779_v5  ;;  %v840_v19 = vadd.f32 %v824_v9, %v1924_v58  ;;  %v825_v57 = vmax.f32 %v796_v32, 0.0 }
 0x12a   : > { %v1029_v43 = vmax.f32 %v994_v44, 0.0  ;;  %v998_v42 = vadd.f32 %v997_v20, %v2147_v33  ;;  %v811_v49 = vpop.f32.mrf.mxu0  ;;  %v1144_v29 = vadd.f32 %v1043_v12, %v1042_v36  ;;  %v1044_v11 = vadd.f32 %v1028_v62, %v836_v47 }
 0x12b   : > { %v999_v16 = vpop.f32.mrf.mxu1  ;;  %v842_v10 = vadd.f32 %v826_v63, %v1941_v18  ;;  %v812_v60 = vadd.f32 %v811_v49, %v1779_v5  ;;  %v829_v62 = vmax.f32 %v806_v53, 0.0  ;;  %v830_v8 = vmax.f32 %v810_v3, 0.0 }
 0x12c   : > { %v1045_v6 = vadd.f32 %v1029_v43, %v837_v23  ;;  %v1030_v46 = vmax.f32 %v998_v42, 0.0  ;;  %v1000_v26 = vadd.f32 %v999_v16, %v2147_v33  ;;  %1145 = vadd.xlane.f32.xlu0 %v1144_v29  ;;  %v813_v14 = vpop.f32.mrf.mxu0  ;;  %v927_v23 = vmax.f32 %v2012_v1, 0.0 }
 0x12d   : > { %v1001_v36 = vpop.f32.mrf.mxu1  ;;  %v843_v33 = vadd.f32 %v827_v56, %v1946_v0  ;;  %v841_v25 = vadd.f32 %v825_v57, %v1937_v24  ;;  %v844_v43 = vadd.f32 %v828_v28, %v1948_v2  ;;  %v814_v42 = vadd.f32 %v813_v14, %v1831_v27 }
 0x12e   : > { %v1031_v52 = vmax.f32 %v1000_v26, 0.0  ;;  %v1002_v12 = vadd.f32 %v1001_v36, %v1810_v17  ;;  %v815_v44 = vpop.f32.mrf.mxu0  ;;  %v1147_v47 = vadd.f32 %v1045_v6, %v1044_v11  ;;  %v1046_v58 = vadd.f32 %v1030_v46, %v838_v51 }
 0x12f   : > { %v1003_v20 = vpop.f32.mrf.mxu1  ;;  %v928_v49 = vadd.f32 %v920_v21, %v842_v10  ;;  %v831_v29 = vmax.f32 %v812_v60, 0.0  ;;  %v846_v3 = vadd.f32 %v830_v8, %v1960_v34  ;;  %v929_v24 = vadd.f32 %v921_v54, %v843_v33 }
 0x130   : > { %v1047_v9 = vadd.f32 %v1031_v52, %v839_v30  ;;  %v1032_v32 = vmax.f32 %v1002_v12, 0.0  ;;  %v1004_v18 = vadd.f32 %v1003_v20, %v1810_v17  ;;  %1148 = vadd.xlane.f32.xlu1 %v1147_v47  ;;  %v1109_v63 = vpop.f32.mrf.mxu0  ;;  %v845_v17 = vadd.f32 %v829_v62, %v1954_v48 }
 0x131   : > { %v1007_v0 = vpop.f32.mrf.mxu1  ;;  %v832_v26 = vmax.f32 %v814_v42, 0.0  ;;  %v816_v14 = vadd.f32 %v815_v44, %v1831_v27  ;;  %v1110_v48 = vadd.f32 %v1109_v63, %v1771_v59  ;;  %v930_v34 = vadd.f32 %v922_v45, %v844_v43 }
 0x132   : > { %v1033_v56 = vmax.f32 %v1004_v18, 0.0  ;;  %v1008_v51 = vadd.f32 %v1007_v0, %v1771_v59  ;;  %v1111_v30 = vpop.f32.mrf.mxu0  ;;  %v1150_v53 = vadd.f32 %v1047_v9, %v1046_v58  ;;  %v1048_v11 = vadd.f32 %v1032_v32, %v840_v19 }
 0x133   : > { %v1009_v2 = vpop.f32.mrf.mxu1  ;;  %v1112_v16 = vadd.f32 %v1111_v30, %v1771_v59  ;;  %v847_v54 = vadd.f32 %v831_v29, %v1967_v39  ;;  %v931_v52 = vadd.f32 %v923_v15, %v845_v17  ;;  %v848_v33 = vadd.f32 %v832_v26, %v1969_v38 }
 0x134   : > { %v1049_v4 = vadd.f32 %v1033_v56, %v841_v25  ;;  %v1034_v21 = vmax.f32 %v1008_v51, 0.0  ;;  %v1010_v6 = vadd.f32 %v1009_v2, %v1771_v59  ;;  %1151 = vadd.xlane.f32.xlu0 %v1150_v53  ;;  %v1113_v46 = vpop.f32.mrf.mxu0  ;;  %v932_v59 = vadd.f32 %v924_v55, %v846_v3 }
 0x135   : > { %v1011_v22 = vpop.f32.mrf.mxu1  ;;  %v1129_v60 = vmax.f32 %v1112_v16, 0.0  ;;  %v833_v62 = vmax.f32 %v816_v14, 0.0  ;;  %v1128_v8 = vmax.f32 %v1110_v48, 0.0  ;;  %v1114_v20 = vadd.f32 %v1113_v46, %v1773_v61 }
 0x136   : > { %v1035_v57 = vmax.f32 %v1010_v6, 0.0  ;;  %v1012_v19 = vadd.f32 %v1011_v22, %v1773_v61  ;;  %v1115_v10 = vpop.f32.mrf.mxu0  ;;  %v1153_v28 = vadd.f32 %v1049_v4, %v1048_v11  ;;  %v1050_v36 = vadd.f32 %v1034_v21, %v928_v49 }
 0x137   : > { %v1013_v12 = vpop.f32.mrf.mxu1  ;;  %v1116_v39 = vadd.f32 %v1115_v10, %v1773_v61  ;;  %v933_v55 = vadd.f32 %v925_v41, %v847_v54  ;;  %v849_v29 = vadd.f32 %v833_v62, %v1979_v40  ;;  %v1130_v56 = vmax.f32 %v1114_v20, 0.0 }
 0x138   : > { %v1051_v44 = vadd.f32 %v1035_v57, %v929_v24  ;;  %v1036_v31 = vmax.f32 %v1012_v19, 0.0  ;;  %v1014_v45 = vadd.f32 %v1013_v12, %v1773_v61  ;;  %1154 = vadd.xlane.f32.xlu0 %v1153_v28  ;;  %v1119_v47 = vpop.f32.mrf.mxu0  ;;  %v1136_v32 = vadd.f32 %v1128_v8, %v1050_v36  ;;  %v1171_v12 = vld [vmem:[%s2135_s3 + $0x18] sm:$0xff] }
 0x139   : > { %v1017_v7 = vpop.f32.mrf.mxu1  ;;  %v1120_v63 = vadd.f32 %v1119_v47, %v1779_v5  ;;  %v1131_v42 = vmax.f32 %v1116_v39, 0.0  ;;  %v934_v35 = vadd.f32 %v926_v37, %v848_v33  ;;  %v935_v6 = vadd.f32 %v927_v23, %v849_v29  ;;  %v1174_v23 = vld [vmem:[%s2135_s3 + $0x30] sm:$0xff] }
 0x13a   : > { %v1137_v15 = vadd.f32 %v1129_v60, %v1051_v44  ;;  %v1037_v58 = vmax.f32 %v1014_v45, 0.0  ;;  %v1018_v13 = vadd.f32 %v1017_v7, %v1779_v5  ;;  %v1121_v9 = vpop.f32.mrf.mxu0  ;;  %v1052_v18 = vadd.f32 %v1036_v31, %v930_v34  ;;  %v1173_v60 = vld [vmem:[%s2135_s3 + $0x28] sm:$0xff]  ;;  %v1168_v31 = vld [vmem:[%s2135_s3] sm:$0xff] }
 0x13b   : > { %v1019_v25 = vpop.f32.mrf.mxu1  ;;  %v1122_v38 = vadd.f32 %v1121_v9, %v1779_v5  ;;  %v1132_v16 = vmax.f32 %v1120_v63, 0.0  ;;  %v1553_v1 = vmov 0.0   ;;  %v1169_v44 = vld [vmem:[%s2135_s3 + $0x8] sm:$0xff] }
 0x13c   : > { %v1053_v43 = vadd.f32 %v1037_v58, %v931_v52  ;;  %v1038_v49 = vmax.f32 %v1018_v13, 0.0  ;;  %v1020_v61 = vadd.f32 %v1019_v25, %v1779_v5  ;;  %v1123_v0 = vpop.f32.mrf.mxu0  ;;  %v1156_v51 = vadd.f32 %v1137_v15, %v1136_v32  ;;  %1423 = vmatprep.subr.mxu0 %v1553_v1  ;;  %1439 = vmatprep.mubr.msk.f32.mxu0 %vm1554_vm2, %v1553_v1  ;;  %v1172_v52 = vld [vmem:[%s2135_s3 + $0x20] sm:$0xff] }
 0x13d   : > { %v1021_v41 = vpop.f32.mrf.mxu1  ;;  %v1138_v2 = vadd.f32 %v1130_v56, %v1052_v18  ;;  %v1133_v11 = vmax.f32 %v1122_v38, 0.0  ;;  %v1124_v5 = vadd.f32 %v1123_v0, %v1831_v27  ;;  %v1176_v58 = vld [vmem:[%s2136_s4] sm:$0x1] }
 0x13e   : > { %v1139_v30 = vadd.f32 %v1131_v42, %v1053_v43  ;;  %v1054_v53 = vadd.f32 %v1038_v49, %v932_v59  ;;  %v1039_v17 = vmax.f32 %v1020_v61, 0.0  ;;  %v1022_v3 = vadd.f32 %v1021_v41, %v1831_v27  ;;  %v1125_v24 = vpop.f32.mrf.mxu0  ;;  %1157 = vadd.xlane.f32.xlu1 %v1156_v51  ;;  %v1170_v59 = vld [vmem:[%s2135_s3 + $0x10] sm:$0xff] }
 0x13f   : > { %v1023_v4 = vpop.f32.mrf.mxu1  ;;  %v1126_v37 = vadd.f32 %v1125_v24, %v1831_v27  ;;  %v1134_v22 = vmax.f32 %v1124_v5, 0.0 }
 0x140   : > { %v1055_v40 = vadd.f32 %v1039_v17, %v933_v55  ;;  %v1040_v21 = vmax.f32 %v1022_v3, 0.0  ;;  %v1024_v50 = vadd.f32 %v1023_v4, %v1831_v27  ;;  %v1159_v46 = vadd.f32 %v1139_v30, %v1138_v2  ;;  %v1175_v27 = vld [vmem:[%s2135_s3 + $0x38] sm:$0xff] }
 0x141   : > { %v1140_v26 = vadd.f32 %v1132_v16, %v1054_v53  ;;  %v1135_v57 = vmax.f32 %v1126_v37, 0.0  ;;  %1424 = vmatpush3.msra.mxu0 %v1175_v27 }
 0x142   : > { %v1141_v14 = vadd.f32 %v1133_v11, %v1055_v40  ;;  %v1056_v48 = vadd.f32 %v1040_v21, %v934_v35  ;;  %v1041_v34 = vmax.f32 %v1024_v50, 0.0  ;;  %1160 = vadd.xlane.f32.xlu0 %v1159_v46  ;;  %1425 = vmatprep.subr.mxu0 %v1553_v1 }
 0x143   : > { %1426 = vmatpush3.msra.mxu0 %v1174_v23 }
 0x144   : > { %v1057_v54 = vadd.f32 %v1041_v34, %v935_v6  ;;  %v1162_v19 = vadd.f32 %v1141_v14, %v1140_v26  ;;  %v1142_v10 = vadd.f32 %v1134_v22, %v1056_v48  ;;  %1427 = vmatprep.subr.mxu0 %v1553_v1 }
 0x145   : > { %1428 = vmatpush3.msra.mxu0 %v1173_v60 }
 0x146   : > { %v1143_v28 = vadd.f32 %v1135_v57, %v1057_v54  ;;  %1163 = vadd.xlane.f32.xlu1 %v1162_v19  ;;  %1429 = vmatprep.subr.mxu0 %v1553_v1 }
 0x147   : > { %1430 = vmatpush3.msra.mxu0 %v1172_v52 }
 0x148   : > { %v1165_v36 = vadd.f32 %v1143_v28, %v1142_v10  ;;  %1431 = vmatprep.subr.mxu0 %v1553_v1 }
 0x149   : > { %1432 = vmatpush3.msra.mxu0 %v1171_v12 }
 0x14a   : > { %1166 = vadd.xlane.f32.xlu0 %v1165_v36  ;;  %1433 = vmatprep.subr.mxu0 %v1553_v1 }
 0x14b   : > { %1434 = vmatpush3.msra.mxu0 %v1170_v59 }
 0x14c   : > { %1435 = vmatprep.subr.mxu0 %v1553_v1 }
 0x14d   : > { %1436 = vmatpush3.msra.mxu0 %v1169_v44 }
 0x14e   : > { %1437 = vmatprep.subr.mxu0 %v1553_v1 }
 0x14f   : > { %1438 = vmatpush3.msra.mxu0 %v1168_v31 }
 0x1b5   : > { %v1146_v45 = vpop.xlane.xlu0 %1145 }
 0x1b6   : > { %1177 = vxpose.xlu1.b32.start [1/8] (short) (narrow) %v1146_v45, 8 }
 0x1b9   : > { %v1149_v39 = vpop.xlane.xlu1 %1148 }
 0x1ba   : > { %1178 = vxpose.xlu1.b32.cont [2/8] (short) (narrow) %v1149_v39, 8 }
 0x1bd   : > { %v1152_v47 = vpop.xlane.xlu0 %1151 }
 0x1be   : > { %1179 = vxpose.xlu1.b32.cont [3/8] (short) (narrow) %v1152_v47, 8 }
 0x1c1   : > { %v1155_v33 = vpop.xlane.xlu0 %1154 }
 0x1c2   : > { %1180 = vxpose.xlu1.b32.cont [4/8] (short) (narrow) %v1155_v33, 8 }
 0x1c7   : > { %v1158_v62 = vpop.xlane.xlu1 %1157 }
 0x1c8   : > { %1181 = vxpose.xlu1.b32.cont [5/8] (short) (narrow) %v1158_v62, 8 }
 0x1cb   : > { %v1161_v8 = vpop.xlane.xlu0 %1160 }
 0x1cc   : > { %1182 = vxpose.xlu1.b32.cont [6/8] (short) (narrow) %v1161_v8, 8 }
 0x1cf   : > { %v1164_v20 = vpop.xlane.xlu1 %1163 }
 0x1d0   : > { %1183 = vxpose.xlu1.b32.cont [7/8] (short) (narrow) %v1164_v20, 8 }
 0x1d3   : > { %v1167_v7 = vpop.xlane.xlu0 %1166 }
 0x1d4   : > { %1184 = vxpose.xlu1.b32.end [8/8] (short) (narrow) %v1167_v7, 8 }
 0x234   : > { %v1193_v15 = vpop.trf.xlu1 }
 0x235   : > { %1440 = vmatmul.mubr.msk.f32.vlgmr.msra.gmra.mxu0 %vm1209_vm3, %v1193_v15 }
 0x2f5   : > { %v1279_v13 = vpop.f32.mrf.mxu0 }
 0x2f6   : > { %v1280_v55 = vadd.f32 %v1279_v13, %v1176_v58 }
 0x2f7   : > { %v1441_v9 = vpop.f32.mrf.mxu0 }
 0x2f8   : > { %1283 = vst [vmem:[%s216_s6] sm:$0x1] %v1280_v55 }
 0x2f9   : > { %1503 = shalt.err (!%p1500_p3)
}
 0x2fa   : > { %s1504_s16 = scalar_lea.hbm %s2097_s10, 16  ;;  %s1508_s13 = scalar_lea.hbm %s2137_s5, 32 }
 0x2fb   : > { %p1505_p4 = scmp.ne.s32.totalorder %s2097_s10, %s1504_s16  ;;  %p1509_p9 = scmp.lt.s32.totalorder %s2097_s10, %s2137_s5 }
 0x2fc   : > { %p1510_p10 = scmp.lt.s32.totalorder %s1508_s13, %s1504_s16 }
 0x2fd   : > { %p1506_p7 = pnand %p1505_p4, %p1624_p5 }
 0x2fe   : > { %p1511_p11 = por %p1510_p10, %p1509_p9 }
 0x2ff   : > { %p1507_p8 = pneg %p1506_p7 }
 0x301   : > { %p1512_p12 = pnand %p1511_p11, %p1507_p8 }
 0x303   : > { %1515 = shalt.err (!%p1512_p12)
}
 0x304   : > { %1442 = dma.vmem_to_hbm [thread:$0]  (%p1624_p5), %s1298_s7, 16, %s2097_s10, %s1285_s11  }
 0x305 PF: > { %p1448_p13 = scmp.ge.s32.totalorder %s1550_s21, 2  ;;  %s1309_s30 = sand.u32 1, %s1538_s18  }
 0x306   : > { %s1310_s6 = scalar_lea.sflag [#allocation3], %s1309_s30 }
 0x307   : > { %p1445_p0 = pnand %p1448_p13, %p1628_p6 }
 0x309   : > { %p1446_p1 = pneg %p1445_p0 }
 0x30b   : > { %1533 = dma.done.wait (%p1446_p1), %s1310_s6, 16  }
 0x30c   : > { %1535 = vsyncadd (%p1446_p1), %s1310_s6, 4294967280  ;;  %p15_p2 = scmp.ge.s32.totalorder %s1611_s24, 4   ;;  %s2148_s18 = smov %s1542_s19 }
 0x30d   : > { %s2149_s19 = smov %s1546_s20  ;;  %s2150_s20 = smov %s1622_s27 }
 0x30e   : > { %s2151_s21 = smov %s1611_s24  ;;  %17 = sbr.rel (!%p15_p2) target bundleno = 3 (0x3), region = 82 }
 0x313   :  { %1314 = vsyncpa [#allocation3], 1 }
 0x314   :  { %1316 = vsyncpa [#allocation3 + $0x1], 1 }

</bundles_post_ra>
